<compile_context>
chip_gen: v7x
topology: tpu7x:2x2x1
jax: 0.10.0
libtpu: 0.0.40
codegen_flags: <defaults>
</compile_context>

<pallas_src>
import jax
import jax.numpy as jnp
from jax import lax
from jax.experimental import pallas as pl
from jax.experimental.pallas import tpu as pltpu


def mlp_kernel(x_ref, w1_ref, b1_ref, w2_ref, b2_ref, w3_ref, b3_ref, o_ref):
    # x_ref: (2, S, 128) VMEM -- two feature planes, batch packed on (sublane, lane)
    # w*/b*: tiny SMEM arrays, read as scalars
    # o_ref: (S, 128) VMEM -- fully dense output block
    H = w1_ref.shape[1]
    S = o_ref.shape[0]

    # Rows per inner step: bounds the live vreg set while keeping the loop body
    # big enough that fori_loop overhead is amortized.  S is always a multiple of 8.
    GROUP = 32
    while S % GROUP:
        GROUP //= 2

    # Hoist all scalar weight/bias reads out of the loop (loop-invariant).
    w1 = [[w1_ref[i, j] for j in range(H)] for i in range(2)]
    b1 = [b1_ref[j] for j in range(H)]
    w2 = [[w2_ref[k, j] for j in range(H)] for k in range(H)]
    b2 = [b2_ref[j] for j in range(H)]
    w3 = [w3_ref[k, 0] for k in range(H)]
    b3 = b3_ref[0]

    def body(g, carry):
        r = pl.multiple_of(g * GROUP, GROUP)
        x0 = x_ref[0, pl.ds(r, GROUP), :]   # (GROUP, 128)
        x1 = x_ref[1, pl.ds(r, GROUP), :]   # (GROUP, 128)

        # Layer 1: Linear(2, H) + ReLU  (VPU broadcast-FMAs over the 2-wide contraction)
        h1 = [jnp.maximum(w1[0][j] * x0 + w1[1][j] * x1 + b1[j], 0.0)
              for j in range(H)]

        # Layer 2: Linear(H, H) + ReLU
        # TODO(synk): if neurons_per_circle grows beyond ~32, replace this unrolled
        # O(H^2) scalar-FMA loop with a VMEM-resident jnp.dot on the MXU.
        h2 = []
        for j in range(H):
            acc = w2[0][j] * h1[0]
            for k in range(1, H):
                acc = acc + w2[k][j] * h1[k]
            h2.append(jnp.maximum(acc + b2[j], 0.0))

        # Layer 3: Linear(H, 1) -> logits
        out = w3[0] * h2[0]
        for k in range(1, H):
            out = out + w3[k] * h2[k]
        o_ref[pl.ds(r, GROUP), :] = (out + b3).astype(o_ref.dtype)
        return carry

    lax.fori_loop(0, S // GROUP, body, 0, unroll=False)


def _round_up(a, m):
    return (a + m - 1) // m * m


def _cdiv(a, b):
    return -(-a // b)


def circle_model_forward_planes(x_planes, params, *, rows_per_step_max=2048):
    """Primary entry point. x_planes: (2, B) float32, feature-major. Returns (B, 1)."""
    w1, b1, w2, b2, w3, b3 = (params[k] for k in ("w1", "b1", "w2", "b2", "w3", "b3"))
    H = w1.shape[1]
    assert H <= 32, "unrolled VPU path is only intended for tiny neurons_per_circle"

    x_planes = x_planes.astype(jnp.float32)
    B = x_planes.shape[1]

    # Batch tiling: rows of 128 lanes, s_block rows (multiple of 8) per grid step.
    rows = _cdiv(B, 128)
    n_steps = max(_cdiv(rows, rows_per_step_max), 1)
    if n_steps == 1 and rows >= 16:
        n_steps = 2  # keep >= 2 tiles so v7x's two TensorCores both get work
    s_block = _round_up(_cdiv(rows, n_steps), 8)
    rows_pad = s_block * n_steps
    b_pad = rows_pad * 128

    # Feature-major -> (2, rows_pad, 128): a fused pad + free contiguous reshape
    # (no transpose, no extra HBM round trip).
    if b_pad != B:
        x_planes = jnp.pad(x_planes, ((0, 0), (0, b_pad - B)))
    xr = x_planes.reshape(2, rows_pad, 128)

    smem = lambda: pl.BlockSpec(memory_space=pltpu.MemorySpace.SMEM)

    out = pl.pallas_call(
        mlp_kernel,
        out_shape=jax.ShapeDtypeStruct((rows_pad, 128), jnp.float32),
        grid=(n_steps,),
        in_specs=[
            pl.BlockSpec((2, s_block, 128), lambda i: (0, i, 0)),  # streamed batch tile
            smem(), smem(), smem(), smem(), smem(), smem(),        # resident weights
        ],
        out_specs=pl.BlockSpec((s_block, 128), lambda i: (i, 0)),  # dense output tile
        compiler_params=pltpu.CompilerParams(
            dimension_semantics=("parallel",),
        ),
        cost_estimate=pl.CostEstimate(
            flops=64 * b_pad, transcendentals=0, bytes_accessed=12 * b_pad),
    )(xr, w1, b1, w2, b2, w3, b3)

    return out.reshape(b_pad)[:B][:, None]


def circle_model_forward(x, params, **kw):
    """Torch-style entry: x is (B, 2) like CircleModel.forward.  Note this pays one
    extra HBM relayout (transpose to feature-major); prefer the planes entry point."""
    return circle_model_forward_planes(x.T, params, **kw)


def init_params(key, neurons_per_circle=4):
    """Matches PyTorch Linear default init U(-1/sqrt(fan_in), 1/sqrt(fan_in)).
    Weights are stored (in_features, out_features) so x @ W + b == torch x @ W.T + b."""
    H = neurons_per_circle
    ks = jax.random.split(key, 6)

    def uniform(k, shape, fan_in):
        bound = 1.0 / jnp.sqrt(jnp.float32(fan_in))
        return jax.random.uniform(k, shape, jnp.float32, -bound, bound)

    return {
        "w1": uniform(ks[0], (2, H), 2),
        "b1": uniform(ks[1], (H,), 2),
        "w2": uniform(ks[2], (H, H), H),
        "b2": uniform(ks[3], (H,), H),
        "w3": uniform(ks[4], (H, 1), H),
        "b3": uniform(ks[5], (1,), H),
    }


def reference_forward(x, params):
    h1 = jnp.maximum(x @ params["w1"] + params["b1"], 0.0)
    h2 = jnp.maximum(h1 @ params["w2"] + params["b2"], 0.0)
    return h2 @ params["w3"] + params["b3"]


if __name__ == "__main__":
    key = jax.random.PRNGKey(0)
    k_param, k_x = jax.random.split(key)

    neurons_per_circle = 4
    batch = 300  # not a multiple of 128: exercises padding

    params = init_params(k_param, neurons_per_circle)
    # Feature-major points (x-coords plane, y-coords plane) in the [0,100]^2 domain.
    x_planes = jax.random.uniform(k_x, (2, batch), jnp.float32, 0.0, 100.0)

    out = circle_model_forward_planes(x_planes, params)
    out = jax.block_until_ready(out)
    ref = reference_forward(x_planes.T, params)
    assert out.shape == (batch, 1)
    assert jnp.allclose(out, ref, atol=1e-4, rtol=1e-4), "mismatch (planes entry)"

    # Second check: larger batch through the torch-style (B, 2) entry; exercises a
    # multi-step grid, the inner GROUP loop, and last-tile padding.
    batch2 = 5000
    x2 = jax.random.uniform(jax.random.PRNGKey(1), (batch2, 2), jnp.float32, 0.0, 100.0)
    out2 = jax.block_until_ready(circle_model_forward(x2, params))
    ref2 = reference_forward(x2, params)
    assert out2.shape == (batch2, 1)
    assert jnp.allclose(out2, ref2, atol=1e-4, rtol=1e-4), "mismatch (torch-style entry)"

    print("KERNEL_OK")
</pallas_src>

<mosaic_0001>
module attributes {stable_mosaic.version = 11 : i64} {
  func.func @mlp_kernel(%arg0: i32, %arg1: memref<2x8x128xf32, #tpu.memory_space<vmem>>, %arg2: memref<2x4xf32, #tpu.memory_space<smem>>, %arg3: memref<4xf32, #tpu.memory_space<smem>>, %arg4: memref<4x4xf32, #tpu.memory_space<smem>>, %arg5: memref<4xf32, #tpu.memory_space<smem>>, %arg6: memref<4x1xf32, #tpu.memory_space<smem>>, %arg7: memref<1xf32, #tpu.memory_space<smem>>, %arg8: memref<8x128xf32, #tpu.memory_space<vmem>>) attributes {dimension_semantics = [#tpu.dimension_semantics<parallel>], iteration_bounds = array<i64: 1>, scalar_prefetch = 0 : i64, scratch_operands = 0 : i64, tpu.core_type = #tpu.core_type<tc>, window_params = [{transform_indices = @transform_0, window_bounds = array<i64: 2, 8, 128>}, {transform_indices = @transform_1, window_bounds = array<i64: 2, 4>}, {transform_indices = @transform_2, window_bounds = array<i64: 4>}, {transform_indices = @transform_3, window_bounds = array<i64: 4, 4>}, {transform_indices = @transform_4, window_bounds = array<i64: 4>}, {transform_indices = @transform_5, window_bounds = array<i64: 4, 1>}, {transform_indices = @transform_6, window_bounds = array<i64: 1>}, {transform_indices = @transform_7, window_bounds = array<i64: 8, 128>}]} {
    %c0 = arith.constant 0 : index
    %c0_0 = arith.constant 0 : index
    %0 = memref.load %arg2[%c0, %c0_0] : memref<2x4xf32, #tpu.memory_space<smem>>
    %c0_1 = arith.constant 0 : index
    %c1 = arith.constant 1 : index
    %1 = memref.load %arg2[%c0_1, %c1] : memref<2x4xf32, #tpu.memory_space<smem>>
    %c0_2 = arith.constant 0 : index
    %c2 = arith.constant 2 : index
    %2 = memref.load %arg2[%c0_2, %c2] : memref<2x4xf32, #tpu.memory_space<smem>>
    %c0_3 = arith.constant 0 : index
    %c3 = arith.constant 3 : index
    %3 = memref.load %arg2[%c0_3, %c3] : memref<2x4xf32, #tpu.memory_space<smem>>
    %c1_4 = arith.constant 1 : index
    %c0_5 = arith.constant 0 : index
    %4 = memref.load %arg2[%c1_4, %c0_5] : memref<2x4xf32, #tpu.memory_space<smem>>
    %c1_6 = arith.constant 1 : index
    %c1_7 = arith.constant 1 : index
    %5 = memref.load %arg2[%c1_6, %c1_7] : memref<2x4xf32, #tpu.memory_space<smem>>
    %c1_8 = arith.constant 1 : index
    %c2_9 = arith.constant 2 : index
    %6 = memref.load %arg2[%c1_8, %c2_9] : memref<2x4xf32, #tpu.memory_space<smem>>
    %c1_10 = arith.constant 1 : index
    %c3_11 = arith.constant 3 : index
    %7 = memref.load %arg2[%c1_10, %c3_11] : memref<2x4xf32, #tpu.memory_space<smem>>
    %c0_12 = arith.constant 0 : index
    %8 = memref.load %arg3[%c0_12] : memref<4xf32, #tpu.memory_space<smem>>
    %c1_13 = arith.constant 1 : index
    %9 = memref.load %arg3[%c1_13] : memref<4xf32, #tpu.memory_space<smem>>
    %c2_14 = arith.constant 2 : index
    %10 = memref.load %arg3[%c2_14] : memref<4xf32, #tpu.memory_space<smem>>
    %c3_15 = arith.constant 3 : index
    %11 = memref.load %arg3[%c3_15] : memref<4xf32, #tpu.memory_space<smem>>
    %c0_16 = arith.constant 0 : index
    %c0_17 = arith.constant 0 : index
    %12 = memref.load %arg4[%c0_16, %c0_17] : memref<4x4xf32, #tpu.memory_space<smem>>
    %c0_18 = arith.constant 0 : index
    %c1_19 = arith.constant 1 : index
    %13 = memref.load %arg4[%c0_18, %c1_19] : memref<4x4xf32, #tpu.memory_space<smem>>
    %c0_20 = arith.constant 0 : index
    %c2_21 = arith.constant 2 : index
    %14 = memref.load %arg4[%c0_20, %c2_21] : memref<4x4xf32, #tpu.memory_space<smem>>
    %c0_22 = arith.constant 0 : index
    %c3_23 = arith.constant 3 : index
    %15 = memref.load %arg4[%c0_22, %c3_23] : memref<4x4xf32, #tpu.memory_space<smem>>
    %c1_24 = arith.constant 1 : index
    %c0_25 = arith.constant 0 : index
    %16 = memref.load %arg4[%c1_24, %c0_25] : memref<4x4xf32, #tpu.memory_space<smem>>
    %c1_26 = arith.constant 1 : index
    %c1_27 = arith.constant 1 : index
    %17 = memref.load %arg4[%c1_26, %c1_27] : memref<4x4xf32, #tpu.memory_space<smem>>
    %c1_28 = arith.constant 1 : index
    %c2_29 = arith.constant 2 : index
    %18 = memref.load %arg4[%c1_28, %c2_29] : memref<4x4xf32, #tpu.memory_space<smem>>
    %c1_30 = arith.constant 1 : index
    %c3_31 = arith.constant 3 : index
    %19 = memref.load %arg4[%c1_30, %c3_31] : memref<4x4xf32, #tpu.memory_space<smem>>
    %c2_32 = arith.constant 2 : index
    %c0_33 = arith.constant 0 : index
    %20 = memref.load %arg4[%c2_32, %c0_33] : memref<4x4xf32, #tpu.memory_space<smem>>
    %c2_34 = arith.constant 2 : index
    %c1_35 = arith.constant 1 : index
    %21 = memref.load %arg4[%c2_34, %c1_35] : memref<4x4xf32, #tpu.memory_space<smem>>
    %c2_36 = arith.constant 2 : index
    %c2_37 = arith.constant 2 : index
    %22 = memref.load %arg4[%c2_36, %c2_37] : memref<4x4xf32, #tpu.memory_space<smem>>
    %c2_38 = arith.constant 2 : index
    %c3_39 = arith.constant 3 : index
    %23 = memref.load %arg4[%c2_38, %c3_39] : memref<4x4xf32, #tpu.memory_space<smem>>
    %c3_40 = arith.constant 3 : index
    %c0_41 = arith.constant 0 : index
    %24 = memref.load %arg4[%c3_40, %c0_41] : memref<4x4xf32, #tpu.memory_space<smem>>
    %c3_42 = arith.constant 3 : index
    %c1_43 = arith.constant 1 : index
    %25 = memref.load %arg4[%c3_42, %c1_43] : memref<4x4xf32, #tpu.memory_space<smem>>
    %c3_44 = arith.constant 3 : index
    %c2_45 = arith.constant 2 : index
    %26 = memref.load %arg4[%c3_44, %c2_45] : memref<4x4xf32, #tpu.memory_space<smem>>
    %c3_46 = arith.constant 3 : index
    %c3_47 = arith.constant 3 : index
    %27 = memref.load %arg4[%c3_46, %c3_47] : memref<4x4xf32, #tpu.memory_space<smem>>
    %c0_48 = arith.constant 0 : index
    %28 = memref.load %arg5[%c0_48] : memref<4xf32, #tpu.memory_space<smem>>
    %c1_49 = arith.constant 1 : index
    %29 = memref.load %arg5[%c1_49] : memref<4xf32, #tpu.memory_space<smem>>
    %c2_50 = arith.constant 2 : index
    %30 = memref.load %arg5[%c2_50] : memref<4xf32, #tpu.memory_space<smem>>
    %c3_51 = arith.constant 3 : index
    %31 = memref.load %arg5[%c3_51] : memref<4xf32, #tpu.memory_space<smem>>
    %c0_52 = arith.constant 0 : index
    %c0_53 = arith.constant 0 : index
    %32 = memref.load %arg6[%c0_52, %c0_53] : memref<4x1xf32, #tpu.memory_space<smem>>
    %c1_54 = arith.constant 1 : index
    %c0_55 = arith.constant 0 : index
    %33 = memref.load %arg6[%c1_54, %c0_55] : memref<4x1xf32, #tpu.memory_space<smem>>
    %c2_56 = arith.constant 2 : index
    %c0_57 = arith.constant 0 : index
    %34 = memref.load %arg6[%c2_56, %c0_57] : memref<4x1xf32, #tpu.memory_space<smem>>
    %c3_58 = arith.constant 3 : index
    %c0_59 = arith.constant 0 : index
    %35 = memref.load %arg6[%c3_58, %c0_59] : memref<4x1xf32, #tpu.memory_space<smem>>
    %c0_60 = arith.constant 0 : index
    %36 = memref.load %arg7[%c0_60] : memref<1xf32, #tpu.memory_space<smem>>
    %c0_i32 = arith.constant 0 : i32
    %c8_i32 = arith.constant 8 : i32
    %37 = arith.muli %c0_i32, %c8_i32 : i32
    %38 = tpu.assume_multiple %37, 8 : i32
    %c0_61 = arith.constant 0 : index
    %39 = arith.index_cast %38 : i32 to index
    %c0_62 = arith.constant 0 : index
    %40 = vector.load %arg1[%c0_61, %39, %c0_62] : memref<2x8x128xf32, #tpu.memory_space<vmem>>, vector<1x8x128xf32>
    %41 = vector.shape_cast %40 : vector<1x8x128xf32> to vector<8x128xf32>
    %c1_63 = arith.constant 1 : index
    %42 = arith.index_cast %38 : i32 to index
    %c0_64 = arith.constant 0 : index
    %43 = vector.load %arg1[%c1_63, %42, %c0_64] : memref<2x8x128xf32, #tpu.memory_space<vmem>>, vector<1x8x128xf32>
    %44 = vector.shape_cast %43 : vector<1x8x128xf32> to vector<8x128xf32>
    %45 = vector.broadcast %0 : f32 to vector<8x128xf32>
    %46 = arith.mulf %45, %41 : vector<8x128xf32>
    %47 = vector.broadcast %4 : f32 to vector<8x128xf32>
    %48 = arith.mulf %47, %44 : vector<8x128xf32>
    %49 = arith.addf %46, %48 : vector<8x128xf32>
    %50 = vector.broadcast %8 : f32 to vector<8x128xf32>
    %51 = arith.addf %49, %50 : vector<8x128xf32>
    %cst = arith.constant 0.000000e+00 : f32
    %52 = vector.broadcast %cst : f32 to vector<8x128xf32>
    %53 = arith.maximumf %51, %52 : vector<8x128xf32>
    %54 = vector.broadcast %1 : f32 to vector<8x128xf32>
    %55 = arith.mulf %54, %41 : vector<8x128xf32>
    %56 = vector.broadcast %5 : f32 to vector<8x128xf32>
    %57 = arith.mulf %56, %44 : vector<8x128xf32>
    %58 = arith.addf %55, %57 : vector<8x128xf32>
    %59 = vector.broadcast %9 : f32 to vector<8x128xf32>
    %60 = arith.addf %58, %59 : vector<8x128xf32>
    %cst_65 = arith.constant 0.000000e+00 : f32
    %61 = vector.broadcast %cst_65 : f32 to vector<8x128xf32>
    %62 = arith.maximumf %60, %61 : vector<8x128xf32>
    %63 = vector.broadcast %2 : f32 to vector<8x128xf32>
    %64 = arith.mulf %63, %41 : vector<8x128xf32>
    %65 = vector.broadcast %6 : f32 to vector<8x128xf32>
    %66 = arith.mulf %65, %44 : vector<8x128xf32>
    %67 = arith.addf %64, %66 : vector<8x128xf32>
    %68 = vector.broadcast %10 : f32 to vector<8x128xf32>
    %69 = arith.addf %67, %68 : vector<8x128xf32>
    %cst_66 = arith.constant 0.000000e+00 : f32
    %70 = vector.broadcast %cst_66 : f32 to vector<8x128xf32>
    %71 = arith.maximumf %69, %70 : vector<8x128xf32>
    %72 = vector.broadcast %3 : f32 to vector<8x128xf32>
    %73 = arith.mulf %72, %41 : vector<8x128xf32>
    %74 = vector.broadcast %7 : f32 to vector<8x128xf32>
    %75 = arith.mulf %74, %44 : vector<8x128xf32>
    %76 = arith.addf %73, %75 : vector<8x128xf32>
    %77 = vector.broadcast %11 : f32 to vector<8x128xf32>
    %78 = arith.addf %76, %77 : vector<8x128xf32>
    %cst_67 = arith.constant 0.000000e+00 : f32
    %79 = vector.broadcast %cst_67 : f32 to vector<8x128xf32>
    %80 = arith.maximumf %78, %79 : vector<8x128xf32>
    %81 = vector.broadcast %12 : f32 to vector<8x128xf32>
    %82 = arith.mulf %81, %53 : vector<8x128xf32>
    %83 = vector.broadcast %16 : f32 to vector<8x128xf32>
    %84 = arith.mulf %83, %62 : vector<8x128xf32>
    %85 = arith.addf %82, %84 : vector<8x128xf32>
    %86 = vector.broadcast %20 : f32 to vector<8x128xf32>
    %87 = arith.mulf %86, %71 : vector<8x128xf32>
    %88 = arith.addf %85, %87 : vector<8x128xf32>
    %89 = vector.broadcast %24 : f32 to vector<8x128xf32>
    %90 = arith.mulf %89, %80 : vector<8x128xf32>
    %91 = arith.addf %88, %90 : vector<8x128xf32>
    %92 = vector.broadcast %28 : f32 to vector<8x128xf32>
    %93 = arith.addf %91, %92 : vector<8x128xf32>
    %cst_68 = arith.constant 0.000000e+00 : f32
    %94 = vector.broadcast %cst_68 : f32 to vector<8x128xf32>
    %95 = arith.maximumf %93, %94 : vector<8x128xf32>
    %96 = vector.broadcast %13 : f32 to vector<8x128xf32>
    %97 = arith.mulf %96, %53 : vector<8x128xf32>
    %98 = vector.broadcast %17 : f32 to vector<8x128xf32>
    %99 = arith.mulf %98, %62 : vector<8x128xf32>
    %100 = arith.addf %97, %99 : vector<8x128xf32>
    %101 = vector.broadcast %21 : f32 to vector<8x128xf32>
    %102 = arith.mulf %101, %71 : vector<8x128xf32>
    %103 = arith.addf %100, %102 : vector<8x128xf32>
    %104 = vector.broadcast %25 : f32 to vector<8x128xf32>
    %105 = arith.mulf %104, %80 : vector<8x128xf32>
    %106 = arith.addf %103, %105 : vector<8x128xf32>
    %107 = vector.broadcast %29 : f32 to vector<8x128xf32>
    %108 = arith.addf %106, %107 : vector<8x128xf32>
    %cst_69 = arith.constant 0.000000e+00 : f32
    %109 = vector.broadcast %cst_69 : f32 to vector<8x128xf32>
    %110 = arith.maximumf %108, %109 : vector<8x128xf32>
    %111 = vector.broadcast %14 : f32 to vector<8x128xf32>
    %112 = arith.mulf %111, %53 : vector<8x128xf32>
    %113 = vector.broadcast %18 : f32 to vector<8x128xf32>
    %114 = arith.mulf %113, %62 : vector<8x128xf32>
    %115 = arith.addf %112, %114 : vector<8x128xf32>
    %116 = vector.broadcast %22 : f32 to vector<8x128xf32>
    %117 = arith.mulf %116, %71 : vector<8x128xf32>
    %118 = arith.addf %115, %117 : vector<8x128xf32>
    %119 = vector.broadcast %26 : f32 to vector<8x128xf32>
    %120 = arith.mulf %119, %80 : vector<8x128xf32>
    %121 = arith.addf %118, %120 : vector<8x128xf32>
    %122 = vector.broadcast %30 : f32 to vector<8x128xf32>
    %123 = arith.addf %121, %122 : vector<8x128xf32>
    %cst_70 = arith.constant 0.000000e+00 : f32
    %124 = vector.broadcast %cst_70 : f32 to vector<8x128xf32>
    %125 = arith.maximumf %123, %124 : vector<8x128xf32>
    %126 = vector.broadcast %15 : f32 to vector<8x128xf32>
    %127 = arith.mulf %126, %53 : vector<8x128xf32>
    %128 = vector.broadcast %19 : f32 to vector<8x128xf32>
    %129 = arith.mulf %128, %62 : vector<8x128xf32>
    %130 = arith.addf %127, %129 : vector<8x128xf32>
    %131 = vector.broadcast %23 : f32 to vector<8x128xf32>
    %132 = arith.mulf %131, %71 : vector<8x128xf32>
    %133 = arith.addf %130, %132 : vector<8x128xf32>
    %134 = vector.broadcast %27 : f32 to vector<8x128xf32>
    %135 = arith.mulf %134, %80 : vector<8x128xf32>
    %136 = arith.addf %133, %135 : vector<8x128xf32>
    %137 = vector.broadcast %31 : f32 to vector<8x128xf32>
    %138 = arith.addf %136, %137 : vector<8x128xf32>
    %cst_71 = arith.constant 0.000000e+00 : f32
    %139 = vector.broadcast %cst_71 : f32 to vector<8x128xf32>
    %140 = arith.maximumf %138, %139 : vector<8x128xf32>
    %141 = vector.broadcast %32 : f32 to vector<8x128xf32>
    %142 = arith.mulf %141, %95 : vector<8x128xf32>
    %143 = vector.broadcast %33 : f32 to vector<8x128xf32>
    %144 = arith.mulf %143, %110 : vector<8x128xf32>
    %145 = arith.addf %142, %144 : vector<8x128xf32>
    %146 = vector.broadcast %34 : f32 to vector<8x128xf32>
    %147 = arith.mulf %146, %125 : vector<8x128xf32>
    %148 = arith.addf %145, %147 : vector<8x128xf32>
    %149 = vector.broadcast %35 : f32 to vector<8x128xf32>
    %150 = arith.mulf %149, %140 : vector<8x128xf32>
    %151 = arith.addf %148, %150 : vector<8x128xf32>
    %152 = vector.broadcast %36 : f32 to vector<8x128xf32>
    %153 = arith.addf %151, %152 : vector<8x128xf32>
    %154 = arith.index_cast %38 : i32 to index
    %c0_72 = arith.constant 0 : index
    %155 = vector.load %arg8[%154, %c0_72] : memref<8x128xf32, #tpu.memory_space<vmem>>, vector<8x128xf32>
    tpu.vector_store %arg8[%154, %c0_72], %153 {strides = array<i32>} : memref<8x128xf32, #tpu.memory_space<vmem>>, vector<8x128xf32>,
    %c1_i32 = arith.constant 1 : i32
    return
  }
  func.func @transform_0(%arg0: i32) -> (i32, i32, i32) {
    %c0_i32 = arith.constant 0 : i32
    %c0_i32_0 = arith.constant 0 : i32
    %c0_i32_1 = arith.constant 0 : i32
    return %c0_i32, %arg0, %c0_i32_0 : i32, i32, i32
  }
  func.func @transform_1(%arg0: i32) -> (i32, i32) {
    %c0_i32 = arith.constant 0 : i32
    %c0_i32_0 = arith.constant 0 : i32
    %c0_i32_1 = arith.constant 0 : i32
    return %c0_i32, %c0_i32_0 : i32, i32
  }
  func.func @transform_2(%arg0: i32) -> i32 {
    %c0_i32 = arith.constant 0 : i32
    %c0_i32_0 = arith.constant 0 : i32
    return %c0_i32 : i32
  }
  func.func @transform_3(%arg0: i32) -> (i32, i32) {
    %c0_i32 = arith.constant 0 : i32
    %c0_i32_0 = arith.constant 0 : i32
    %c0_i32_1 = arith.constant 0 : i32
    return %c0_i32, %c0_i32_0 : i32, i32
  }
  func.func @transform_4(%arg0: i32) -> i32 {
    %c0_i32 = arith.constant 0 : i32
    %c0_i32_0 = arith.constant 0 : i32
    return %c0_i32 : i32
  }
  func.func @transform_5(%arg0: i32) -> (i32, i32) {
    %c0_i32 = arith.constant 0 : i32
    %c0_i32_0 = arith.constant 0 : i32
    %c0_i32_1 = arith.constant 0 : i32
    return %c0_i32, %c0_i32_0 : i32, i32
  }
  func.func @transform_6(%arg0: i32) -> i32 {
    %c0_i32 = arith.constant 0 : i32
    %c0_i32_0 = arith.constant 0 : i32
    return %c0_i32 : i32
  }
  func.func @transform_7(%arg0: i32) -> (i32, i32) {
    %c0_i32 = arith.constant 0 : i32
    %c0_i32_0 = arith.constant 0 : i32
    return %arg0, %c0_i32 : i32, i32
  }
}

</mosaic_0001>

<bundles_post_ra>
// kernel: tpu_custom_call.1
= control target key start
LH: loop header
LB: loop body
LE: loop exit
PB: predicated region body
PF: predicated region fallthrough
CT: control target
= control target key end

     0   :  { %13 = vsyncpa [#allocation4], 0  ;;  %s595_s0 = inlined_call_operand.hbm [shape: f32[2,8,128], index: 0, kind: input, shape index: {}]   ;;  %s596_s1 = inlined_call_operand.vmem [shape: f32[2,4], index: 1, kind: input, shape index: {}]   ;;  %s597_s2 = inlined_call_operand.vmem [shape: f32[4], index: 2, kind: input, shape index: {}]   ;;  %s598_s3 = inlined_call_operand.vmem [shape: f32[4,4], index: 3, kind: input, shape index: {}]   ;;  %s599_s4 = inlined_call_operand.vmem [shape: f32[4], index: 4, kind: input, shape index: {}]   ;;  %s600_s5 = inlined_call_operand.vmem [shape: f32[4,1], index: 5, kind: input, shape index: {}]   ;;  %s601_s6 = inlined_call_operand.<no memory space> [shape: f32[1], index: 6, kind: input, shape index: {}]   ;;  %s602_s7 = inlined_call_operand.hbm [shape: f32[8,128], index: 7, kind: output, shape index: {}]  }
   0x1   :  { %14 = vsyncpa [#allocation6], 0 }
   0x2   :  { %15 = vsyncpa [#allocation9], 0 }
   0x3   :  { %16 = vsyncpa [#allocation12], 0  ;;  %s46_s26 = sshll.u32 %s597_s2, 4  ;;  %s47_s26 = int_to_ptr.vmem [resolvable:$true] %s46_s26 }
   0x4   :  { %17 = vsyncpa [#allocation5], 0  ;;  %s66_s29 = sshll.u32 %s599_s4, 4  ;;  %s303_s30 = scalar_lea.vmem %s47_s26, 16  ;;  %s67_s29 = int_to_ptr.vmem [resolvable:$true] %s66_s29 }
   0x5   :  { %p304_p0 = scmp.ne.s32.totalorder %s47_s26, %s303_s30  ;;  %p308_p1 = scmp.lt.s32.totalorder %s47_s26, %s47_s26 }
   0x6   :  { %p309_p2 = scmp.lt.s32.totalorder %s303_s30, %s303_s30 }
   0x8   :  { %p310_p3 = por %p309_p2, %p308_p1 }
   0xa   :  { %p311_p4 = pnand %p310_p3, %p304_p0 }
   0xc   :  { %314 = shalt.err (!%p311_p4)
}
   0xd   :  { %s417_s8 = smov [#allocation8]   ;;  %s315_s9 = scalar_lea.vmem %s67_s29, 16 }
   0xe   :  { %49 = dma.vmem_to_smem %s47_s26, 16, %s417_s8, [#allocation9]  }
   0xf   :  { %p316_p5 = scmp.ne.s32.totalorder %s67_s29, %s315_s9  ;;  %p320_p6 = scmp.lt.s32.totalorder %s67_s29, %s67_s29 }
  0x10   :  { %p321_p7 = scmp.lt.s32.totalorder %s315_s9, %s315_s9 }
  0x12   :  { %p322_p8 = por %p321_p7, %p320_p6 }
  0x14   :  { %p323_p9 = pnand %p322_p8, %p316_p5 }
  0x16   :  { %326 = shalt.err (!%p323_p9)
}
  0x17   :  { %s418_s2 = smov [#allocation11]   ;;  %s419_s4 = smov [#allocation3]  }
  0x18   :  { %69 = dma.vmem_to_smem %s67_s29, 16, %s418_s2, [#allocation12]  }
  0x19   :  { %s23_s10 = sshll.u32 %s419_s4, 4  ;;  %s36_s13 = sshll.u32 %s596_s1, 4  ;;  %s24_s10 = int_to_ptr.vmem [resolvable:$true] %s23_s10  ;;  %s37_s13 = int_to_ptr.vmem [resolvable:$true] %s36_s13 }
  0x1a   :  { %s327_s16 = scalar_lea.hbm %s595_s0, 256 }
  0x1b   :  { %p328_p10 = scmp.ne.s32.totalorder %s595_s0, %s327_s16  ;;  %p331_p11 = scmp.lt.u32.totalorder %s327_s16, %s595_s0 }
  0x1d   :  { %p333_p12 = pnand %p331_p11, %p328_p10 }
  0x1f   :  { %336 = shalt.err (!%p333_p12)
}
  0x20   :  { %s337_s21 = scalar_lea.vmem %s24_s10, 256  ;;  %p342_p0 = scmp.lt.s32.totalorder %s24_s10, %s24_s10 }
  0x21   :  { %p338_p13 = scmp.ne.s32.totalorder %s24_s10, %s337_s21  ;;  %p343_p1 = scmp.lt.s32.totalorder %s337_s21, %s337_s21 }
  0x23   :  { %p344_p2 = por %p343_p1, %p342_p0 }
  0x25   :  { %p345_p3 = pnand %p344_p2, %p338_p13 }
  0x27   :  { %348 = shalt.err (!%p345_p3)
}
  0x28   :  { %s420_s1 = smov 128   ;;  %s421_s22 = smov 8  }
  0x29   :  { %29 = dma.hbm_to_vmem [thread:$0]  %s595_s0, 256, %s24_s10, [#allocation4], %s420_s1, %s420_s1, %s421_s22  }
  0x2a   :  { %s349_s25 = scalar_lea.vmem %s37_s13, 32  ;;  %p354_p5 = scmp.lt.s32.totalorder %s37_s13, %s37_s13 }
  0x2b   :  { %p350_p4 = scmp.ne.s32.totalorder %s37_s13, %s349_s25  ;;  %p355_p6 = scmp.lt.s32.totalorder %s349_s25, %s349_s25 }
  0x2d   :  { %p356_p7 = por %p355_p6, %p354_p5 }
  0x2f   :  { %p357_p8 = pnand %p356_p7, %p350_p4 }
  0x31   :  { %360 = shalt.err (!%p357_p8)
}
  0x32   :  { %s422_s26 = smov [#allocation7]   ;;  %s56_s29 = sshll.u32 %s598_s3, 4  ;;  %s57_s29 = int_to_ptr.vmem [resolvable:$true] %s56_s29 }
  0x33   :  { %39 = dma.vmem_to_smem %s37_s13, 32, %s422_s26, [#allocation6]  }
  0x34   :  { %s76_s9 = sshll.u32 %s600_s5, 4  ;;  %s361_s0 = scalar_lea.vmem %s57_s29, 64  ;;  %s77_s9 = int_to_ptr.vmem [resolvable:$true] %s76_s9 }
  0x35   :  { %p362_p9 = scmp.ne.s32.totalorder %s57_s29, %s361_s0  ;;  %p366_p10 = scmp.lt.s32.totalorder %s57_s29, %s57_s29 }
  0x36   :  { %p367_p11 = scmp.lt.s32.totalorder %s361_s0, %s361_s0 }
  0x38   :  { %p368_p12 = por %p367_p11, %p366_p10 }
  0x3a   :  { %p369_p13 = pnand %p368_p12, %p362_p9 }
  0x3c   :  { %372 = shalt.err (!%p369_p13)
}
  0x3d   :  { %s423_s2 = smov [#allocation10]   ;;  %s373_s4 = scalar_lea.vmem %s77_s9, 64 }
  0x3e   :  { %59 = dma.vmem_to_smem %s57_s29, 64, %s423_s2, [#allocation9]  }
  0x3f   :  { %p374_p0 = scmp.ne.s32.totalorder %s77_s9, %s373_s4  ;;  %p378_p1 = scmp.lt.s32.totalorder %s77_s9, %s77_s9 }
  0x40   :  { %p379_p2 = scmp.lt.s32.totalorder %s373_s4, %s373_s4 }
  0x42   :  { %p380_p3 = por %p379_p2, %p378_p1 }
  0x44   :  { %p381_p4 = pnand %p380_p3, %p374_p0 }
  0x46   :  { %384 = shalt.err (!%p381_p4)
}
  0x47   :  { %s424_s3 = smov [#allocation13]  }
  0x48   :  { %79 = dma.vmem_to_smem %s77_s9, 64, %s424_s3, [#allocation12]  }
  0x49   :  { %407 = dma.done.wait [#allocation4], 256  }
  0x4a   :  { %408 = vsyncadd [#allocation4], 4294967040 }
  0x4b   :  { %409 = dma.done.wait [#allocation6], 32  }
  0x4c   :  { %410 = vsyncadd [#allocation6], 4294967264 }
  0x4d   :  { %411 = dma.done.wait [#allocation9], 80  }
  0x4e   :  { %412 = vsyncadd [#allocation9], 4294967216 }
  0x4f   :  { %413 = dma.done.wait [#allocation12], 80  }
  0x50   :  { %414 = vsyncadd [#allocation12], 4294967216 }
  0x51   :  { %100 = sfence }
  0x52   :  { %s101_s5 = sld [smem:[#allocation7]]  ;;  %s263_s10 = sld [smem:[#allocation7 + $0x1]]  ;;  %v138_v0 = vld [vmem:[#allocation3] sm:$0xff]  ;;  %v141_v1 = vld [vmem:[#allocation3 + $0x8] sm:$0xff] }
  0x53   :  { %s264_s11 = sld [smem:[#allocation7 + $0x2]]  ;;  %s265_s12 = sld [smem:[#allocation7 + $0x3]] }
  0x54   :  { %s266_s13 = sld [smem:[#allocation7 + $0x80]]  ;;  %s267_s14 = sld [smem:[#allocation7 + $0x81]] }
  0x55   :  { %s493_s15 = sld [smem:[#allocation7 + $0x82]]  ;;  %s495_s16 = sld [smem:[#allocation7 + $0x83]] }
  0x56   :  { %s497_s17 = sld [smem:[#allocation8]]  ;;  %s499_s18 = sld [smem:[#allocation8 + $0x1]] }
  0x57   :  { %s501_s19 = sld [smem:[#allocation8 + $0x2]]  ;;  %s503_s20 = sld [smem:[#allocation8 + $0x3]] }
  0x58   :  { %s505_s21 = sld [smem:[#allocation10]]  ;;  %s507_s1 = sld [smem:[#allocation10 + $0x1]]  ;;  %v142_v2 = vstv %s101_s5  ;;  %v150_v3 = vstv %s263_s10 }
  0x59   :  { %s509_s22 = sld [smem:[#allocation10 + $0x2]]  ;;  %s511_s23 = sld [smem:[#allocation10 + $0x3]]  ;;  %v143_v4 = vmul.f32 %v142_v2, %v138_v0  ;;  %v151_v5 = vmul.f32 %v150_v3, %v138_v0  ;;  %v158_v6 = vstv %s264_s11  ;;  %v166_v7 = vstv %s265_s12 }
  0x5a   :  { %s513_s24 = sld [smem:[#allocation10 + $0x80]]  ;;  %s515_s25 = sld [smem:[#allocation10 + $0x81]]  ;;  %v144_v8 = vstv %s266_s13  ;;  %v152_v9 = vstv %s267_s14  ;;  %v159_v10 = vmul.f32 %v158_v6, %v138_v0  ;;  %v167_v11 = vmul.f32 %v166_v7, %v138_v0 }
  0x5b   :  { %s517_s26 = sld [smem:[#allocation10 + $0x82]]  ;;  %v145_v12 = vmul.f32 %v144_v8, %v141_v1  ;;  %v153_v13 = vmul.f32 %v152_v9, %v141_v1  ;;  %v160_v14 = vstv %s493_s15  ;;  %v168_v15 = vstv %s495_s16  ;;  %s521_s27 = sld [smem:[#allocation10 + $0x100]] }
  0x5c   :  { %s523_s28 = sld [smem:[#allocation10 + $0x101]]  ;;  %v147_v16 = vstv %s497_s17  ;;  %v155_v17 = vstv %s499_s18  ;;  %v161_v18 = vmul.f32 %v160_v14, %v141_v1  ;;  %v169_v19 = vmul.f32 %v168_v15, %v141_v1  ;;  %s527_s29 = sld [smem:[#allocation10 + $0x83]] }
  0x5d   :  { %v146_v20 = vadd.f32 %v145_v12, %v143_v4  ;;  %v154_v21 = vadd.f32 %v153_v13, %v151_v5  ;;  %v163_v22 = vstv %s501_s19  ;;  %v171_v23 = vstv %s503_s20  ;;  %s531_s30 = sld [smem:[#allocation10 + $0x180]]  ;;  %s533_s8 = sld [smem:[#allocation10 + $0x181]] }
  0x5e   :  { %v162_v24 = vadd.f32 %v161_v18, %v159_v10  ;;  %v170_v25 = vadd.f32 %v169_v19, %v167_v11  ;;  %v174_v26 = vstv %s505_s21  ;;  %s536_s9 = sld [smem:[#allocation10 + $0x102]]  ;;  %v188_v29 = vstv %s507_s1  ;;  %s542_s2 = sld [smem:[#allocation11]] }
  0x5f   :  { %s538_s0 = sld [smem:[#allocation10 + $0x182]]  ;;  %v148_v27 = vadd.f32 %v147_v16, %v146_v20  ;;  %v156_v28 = vadd.f32 %v155_v17, %v154_v21  ;;  %v202_v30 = vstv %s509_s22  ;;  %s544_s4 = sld [smem:[#allocation11 + $0x1]]  ;;  %v216_v38 = vstv %s511_s23 }
  0x60   :  { %v164_v31 = vadd.f32 %v163_v22, %v162_v24  ;;  %v172_v32 = vadd.f32 %v171_v23, %v170_v25  ;;  %v176_v33 = vstv %s513_s24  ;;  %v190_v34 = vstv %s515_s25  ;;  %s548_s3 = sld [smem:[#allocation10 + $0x103]]  ;;  %s554_s10 = sld [smem:[#allocation11 + $0x2]] }
  0x61   :  { %v149_v35 = vmax.f32 %v148_v27, 0.0  ;;  %v157_v36 = vmax.f32 %v156_v28, 0.0  ;;  %v204_v37 = vstv %s517_s26  ;;  %s552_s5 = sld [smem:[#allocation10 + $0x183]]  ;;  %v179_v41 = vstv %s521_s27  ;;  %s558_s11 = sld [smem:[#allocation13]] }
  0x62   :  { %v165_v39 = vmax.f32 %v164_v31, 0.0  ;;  %v173_v40 = vmax.f32 %v172_v32, 0.0  ;;  %v193_v42 = vstv %s523_s28  ;;  %s560_s12 = sld [smem:[#allocation13 + $0x80]]  ;;  %s564_s13 = sld [smem:[#allocation11 + $0x3]]  ;;  %v218_v58 = vstv %s527_s29 }
  0x63   :  { %v175_v43 = vmul.f32 %v174_v26, %v149_v35  ;;  %v177_v44 = vmul.f32 %v176_v33, %v157_v36  ;;  %v189_v45 = vmul.f32 %v188_v29, %v149_v35  ;;  %v191_v46 = vmul.f32 %v190_v34, %v157_v36  ;;  %s568_s14 = sld [smem:[#allocation13 + $0x100]]  ;;  %s425_s18 = smov [#allocation14]  }
  0x64   :  { %v180_v47 = vmul.f32 %v179_v41, %v165_v39  ;;  %v182_v48 = vstv %s531_s30  ;;  %v194_v49 = vmul.f32 %v193_v42, %v165_v39  ;;  %v196_v50 = vstv %s533_s8  ;;  %s293_s15 = sld [smem:[#allocation13 + $0x180]]  ;;  %s250_s19 = sshll.u32 %s425_s18, 4  ;;  %s251_s19 = int_to_ptr.vmem [resolvable:$true] %s250_s19 }
  0x65   :  { %v178_v51 = vadd.f32 %v177_v44, %v175_v43  ;;  %v183_v52 = vmul.f32 %v182_v48, %v173_v40  ;;  %v192_v53 = vadd.f32 %v191_v46, %v189_v45  ;;  %v197_v54 = vmul.f32 %v196_v50, %v173_v40  ;;  %s385_s20 = scalar_lea.vmem %s251_s19, 128  ;;  %p390_p6 = scmp.lt.s32.totalorder %s251_s19, %s251_s19 }
  0x66   :  { %v185_v55 = vstv %s542_s2  ;;  %v203_v56 = vmul.f32 %v202_v30, %v149_v35  ;;  %v205_v57 = vmul.f32 %v204_v37, %v157_v36  ;;  %v207_v61 = vstv %s536_s9  ;;  %p386_p5 = scmp.ne.s32.totalorder %s251_s19, %s385_s20  ;;  %p391_p7 = scmp.lt.s32.totalorder %s385_s20, %s385_s20 }
  0x67   :  { %v181_v59 = vadd.f32 %v180_v47, %v178_v51  ;;  %v195_v60 = vadd.f32 %v194_v49, %v192_v53  ;;  %v210_v62 = vstv %s538_s0  ;;  %v199_v63 = vstv %s544_s4 }
  0x68   :  { %v206_v0 = vadd.f32 %v205_v57, %v203_v56  ;;  %v208_v1 = vmul.f32 %v207_v61, %v165_v39  ;;  %v211_v2 = vmul.f32 %v210_v62, %v173_v40  ;;  %v217_v5 = vmul.f32 %v216_v38, %v149_v35  ;;  %p392_p8 = por %p391_p7, %p390_p6 }
  0x69   :  { %v184_v3 = vadd.f32 %v183_v52, %v181_v59  ;;  %v198_v4 = vadd.f32 %v197_v54, %v195_v60  ;;  %v219_v6 = vmul.f32 %v218_v58, %v157_v36  ;;  %v213_v8 = vstv %s554_s10 }
  0x6a   :  { %v209_v7 = vadd.f32 %v208_v1, %v206_v0  ;;  %v221_v9 = vstv %s548_s3  ;;  %v224_v10 = vstv %s552_s5  ;;  %v230_v17 = vstv %s558_s11  ;;  %p393_p9 = pnand %p392_p8, %p386_p5 }
  0x6b   :  { %v186_v11 = vadd.f32 %v185_v55, %v184_v3  ;;  %v200_v12 = vadd.f32 %v199_v63, %v198_v4  ;;  %v220_v13 = vadd.f32 %v219_v6, %v217_v5  ;;  %v222_v14 = vmul.f32 %v221_v9, %v165_v39 }
  0x6c   :  { %v212_v15 = vadd.f32 %v211_v2, %v209_v7  ;;  %v225_v16 = vmul.f32 %v224_v10, %v173_v40  ;;  %v232_v18 = vstv %s560_s12  ;;  %v227_v23 = vstv %s564_s13 }
  0x6d   :  { %v187_v19 = vmax.f32 %v186_v11, 0.0  ;;  %v201_v20 = vmax.f32 %v200_v12, 0.0  ;;  %v223_v21 = vadd.f32 %v222_v14, %v220_v13  ;;  %v235_v27 = vstv %s568_s14 }
  0x6e   :  { %v214_v22 = vadd.f32 %v213_v8, %v212_v15  ;;  %v238_v32 = vstv %s293_s15  ;;  %v241_v36 = vstv %s601_s6 }
  0x6f   :  { %v226_v24 = vadd.f32 %v225_v16, %v223_v21  ;;  %v231_v25 = vmul.f32 %v230_v17, %v187_v19  ;;  %v233_v26 = vmul.f32 %v232_v18, %v201_v20 }
  0x70   :  { %v215_v28 = vmax.f32 %v214_v22, 0.0 }
  0x71   :  { %v228_v29 = vadd.f32 %v227_v23, %v226_v24  ;;  %v234_v30 = vadd.f32 %v233_v26, %v231_v25 }
  0x72   :  { %v236_v31 = vmul.f32 %v235_v27, %v215_v28 }
  0x73   :  { %v229_v33 = vmax.f32 %v228_v29, 0.0 }
  0x74   :  { %v237_v34 = vadd.f32 %v236_v31, %v234_v30 }
  0x75   :  { %v239_v35 = vmul.f32 %v238_v32, %v229_v33 }
  0x77   :  { %v240_v37 = vadd.f32 %v239_v35, %v237_v34 }
  0x79   :  { %v242_v38 = vadd.f32 %v241_v36, %v240_v37 }
  0x7b   :  { %243 = vst [vmem:[#allocation14] sm:$0xff] %v242_v38 }
  0x7c   :  { %396 = shalt.err (!%p393_p9)
}
  0x7d   :  { %s397_s22 = scalar_lea.hbm %s602_s7, 128 }
  0x7e   :  { %p398_p10 = scmp.ne.s32.totalorder %s602_s7, %s397_s22  ;;  %p401_p11 = scmp.lt.u32.totalorder %s397_s22, %s602_s7 }
  0x80   :  { %p403_p12 = pnand %p401_p11, %p398_p10 }
  0x82   :  { %406 = shalt.err (!%p403_p12)
}
  0x83   :  { %253 = dma.vmem_to_hbm [thread:$0]  %s251_s19, 128, %s602_s7, [#allocation5]  }
  0x84   :  { %415 = dma.done.wait [#allocation5], 128  }
  0x85   :  { %416 = vsyncadd [#allocation5], 4294967168 }
  0x86   :  { %257 = vsyncpa [#allocation4], 1 }
  0x87   :  { %258 = vsyncpa [#allocation5], 1 }
  0x88   :  { %259 = vsyncpa [#allocation6], 1 }
  0x89   :  { %260 = vsyncpa [#allocation9], 1 }
  0x8a   :  { %261 = vsyncpa [#allocation12], 1 }

</bundles_post_ra>
